<compile_context>
chip_gen: v6e
topology: v6e:2x2x1
jax: 0.10.0
libtpu: 0.0.40
codegen_flags: <defaults>
</compile_context>

<pallas_src>
import functools

import jax
import jax.numpy as jnp
from jax import lax
from jax.experimental import pallas as pl
from jax.experimental.pallas import tpu as pltpu


def _block_kernel(x_ref, adj_ref, eye_ref, w1_ref, b1_ref, w2_ref, b2_ref,
                  wl1_ref, wl2_ref, bl_ref, out_ref, *, compute_dtype):
    f32 = jnp.float32
    cd = compute_dtype

    x = x_ref[...]          # (Bt, N, Cin) f32
    adj = adj_ref[...]      # (Bt, N, N)   f32
    eye = eye_ref[...]      # (N, N)       0/1 diag mask (batch-invariant)

    Bt, N, Cin = x.shape
    H = w1_ref.shape[1]
    Cp = wl1_ref.shape[1]   # lane-padded output width (multiple of 128)

    # add_loop: set diagonal of adj to 1 (DenseGCNConv sets, does not add)
    adj = jnp.where(eye > 0, f32(1.0), adj)

    # symmetric degree normalization: D^{-1/2} A D^{-1/2}
    deg = jnp.sum(adj, axis=-1, keepdims=True)              # (Bt, N, 1)
    dinv = lax.rsqrt(jnp.maximum(deg, f32(1.0)))            # clamp(min=1) ** -0.5
    adj_n = dinv * adj * jnp.swapaxes(dinv, -1, -2)         # (Bt, N, N) f32

    adj_c = adj_n.astype(cd)
    w1 = w1_ref[...].astype(cd)
    w2 = w2_ref[...].astype(cd)
    wl1 = wl1_ref[...].astype(cd)
    wl2 = wl2_ref[...].astype(cd)

    # ---- conv1 + relu -------------------------------------------------------
    # relu(adj_n @ (x @ W1) + b1); associativity lets us pick the cheap order.
    if Cin <= H:
        ax = jnp.einsum("bij,bjk->bik", adj_c, x.astype(cd),
                        preferred_element_type=f32)          # (Bt, N, Cin)
        h1 = jnp.dot(ax.reshape(Bt * N, Cin).astype(cd), w1,
                     preferred_element_type=f32)             # (Bt*N, H)
    else:
        xw = jnp.dot(x.reshape(Bt * N, Cin).astype(cd), w1,
                     preferred_element_type=f32).reshape(Bt, N, H)
        h1 = jnp.einsum("bij,bjk->bik", adj_c, xw.astype(cd),
                        preferred_element_type=f32).reshape(Bt * N, H)
    h1 = jnp.maximum(h1 + b1_ref[...], 0.0)                  # (Bt*N, H) f32

    # ---- conv2 + relu -------------------------------------------------------
    h1w = jnp.dot(h1.astype(cd), w2,
                  preferred_element_type=f32).reshape(Bt, N, H)
    h2 = jnp.einsum("bij,bjk->bik", adj_c, h1w.astype(cd),
                    preferred_element_type=f32).reshape(Bt * N, H)
    h2 = jnp.maximum(h2 + b2_ref[...], 0.0)                  # (Bt*N, H) f32

    # ---- lin(cat(h1, h2, -1)) == h1 @ Wl1 + h2 @ Wl2 + b --------------------
    out = (jnp.dot(h1.astype(cd), wl1, preferred_element_type=f32)
           + jnp.dot(h2.astype(cd), wl2, preferred_element_type=f32)
           + bl_ref[...])                                    # (Bt*N, Cp)
    out_ref[...] = out.reshape(Bt, N, Cp).astype(out_ref.dtype)


def _pick_batch_tile(B, N, Cin, H, Cp, vmem_budget_bytes=8 << 20):
    """Largest divisor of B that fits the per-step VMEM budget while keeping
    >= 2 grid steps when B >= 2 (so both v7x TensorCores get work)."""
    per_b = 4 * 2 * (N * N + N * Cin + N * Cp)       # double-buffered I/O blocks
    per_b += 4 * (2 * N * N + 3 * N * H + N * Cp)    # adj/adj_n + activations
    cap = max(1, vmem_budget_bytes // per_b)
    divs = [d for d in range(1, B + 1) if B % d == 0 and d <= cap] or [1]
    two_step = [d for d in divs if B // d >= 2]
    return max(two_step) if two_step else max(divs)


def block_forward(x, adj, params, *, compute_dtype=jnp.float32, batch_tile=None):
    """x: [B, N, Cin] f32, adj: [B, N, N] f32 -> [B, N, Cout] f32."""
    B, N, Cin = x.shape
    w1, b1, w2, b2, wl, bl = (params["w1"], params["b1"], params["w2"],
                              params["b2"], params["wl"], params["bl"])
    H = w1.shape[1]
    Cout = wl.shape[1]

    # Lane-dense output: pad Cout (and the concat-linear weight/bias) to a
    # multiple of 128 so the out store is a full-lane vst, not a masked one.
    Cp = 128 * pl.cdiv(Cout, 128)
    wl1 = jnp.pad(wl[:H], ((0, 0), (0, Cp - Cout)))
    wl2 = jnp.pad(wl[H:], ((0, 0), (0, Cp - Cout)))
    bl_p = jnp.pad(bl, (0, Cp - Cout))[None, :]
    b1_2d, b2_2d = b1[None, :], b2[None, :]

    # Hoisted diagonal mask (batch-invariant input instead of in-kernel iotas).
    eye = jnp.eye(N, dtype=jnp.float32)

    Bt = batch_tile if batch_tile is not None else _pick_batch_tile(B, N, Cin, H, Cp)
    assert B % Bt == 0, "batch tile must divide batch"
    grid = (B // Bt,)

    kernel = functools.partial(_block_kernel, compute_dtype=compute_dtype)

    grid_spec = pltpu.PrefetchScalarGridSpec(
        num_scalar_prefetch=0,
        grid=grid,
        in_specs=[
            pl.BlockSpec((Bt, N, Cin), lambda b: (b, 0, 0)),  # x
            pl.BlockSpec((Bt, N, N), lambda b: (b, 0, 0)),    # adj
            pl.BlockSpec((N, N), lambda b: (0, 0)),           # eye mask
            pl.BlockSpec((Cin, H), lambda b: (0, 0)),         # w1
            pl.BlockSpec((1, H), lambda b: (0, 0)),           # b1
            pl.BlockSpec((H, H), lambda b: (0, 0)),           # w2
            pl.BlockSpec((1, H), lambda b: (0, 0)),           # b2
            pl.BlockSpec((H, Cp), lambda b: (0, 0)),          # wl top half (padded)
            pl.BlockSpec((H, Cp), lambda b: (0, 0)),          # wl bottom half (padded)
            pl.BlockSpec((1, Cp), lambda b: (0, 0)),          # bl (padded)
        ],
        out_specs=pl.BlockSpec((Bt, N, Cp), lambda b: (b, 0, 0)),
    )

    out_padded = pl.pallas_call(
        kernel,
        out_shape=jax.ShapeDtypeStruct((B, N, Cp), jnp.float32),
        grid_spec=grid_spec,
        compiler_params=pltpu.CompilerParams(
            dimension_semantics=("parallel",),
            vmem_limit_bytes=64 * 1024 * 1024),
    )(x, adj, eye, w1, b1_2d, w2, b2_2d, wl1, wl2, bl_p)

    return out_padded[..., :Cout]


def init_params(key, in_channels, hidden_channels, out_channels):
    k1, k2, k3, k4 = jax.random.split(key, 4)

    def glorot(k, shape):
        fan_in, fan_out = shape
        lim = (6.0 / (fan_in + fan_out)) ** 0.5
        return jax.random.uniform(k, shape, jnp.float32, -lim, lim)

    return {
        # DenseGCNConv: lin (no bias) weight [in, hidden], separate bias [hidden]
        "w1": glorot(k1, (in_channels, hidden_channels)),
        "b1": jnp.zeros((hidden_channels,), jnp.float32),
        "w2": glorot(k2, (hidden_channels, hidden_channels)),
        "b2": jnp.zeros((hidden_channels,), jnp.float32),
        # Linear(2*hidden, out) with bias
        "wl": glorot(k3, (2 * hidden_channels, out_channels)),
        "bl": 0.01 * jax.random.normal(k4, (out_channels,), jnp.float32),
    }


def _reference(x, adj, params):
    """Pure-JAX reference of Block.forward (mask=None, add_loop=True)."""
    def gcn(xin, adj, w, b):
        N = adj.shape[-1]
        eye = jnp.eye(N, dtype=adj.dtype)
        a = jnp.where(eye > 0, 1.0, adj)
        d = jnp.clip(a.sum(-1), 1.0, None) ** -0.5
        a = d[..., :, None] * a * d[..., None, :]
        return jnp.einsum("bij,bjk->bik", a, xin @ w) + b

    x1 = jax.nn.relu(gcn(x, adj, params["w1"], params["b1"]))
    x2 = jax.nn.relu(gcn(x1, adj, params["w2"], params["b2"]))
    return jnp.concatenate([x1, x2], -1) @ params["wl"] + params["bl"]


if __name__ == "__main__":
    B, N = 2, 16
    in_channels, hidden_channels, out_channels = 4, 32, 8

    key = jax.random.PRNGKey(0)
    kx, ka, kp = jax.random.split(key, 3)

    x = jax.random.normal(kx, (B, N, in_channels), jnp.float32)
    adj = (jax.random.uniform(ka, (B, N, N)) < 0.3).astype(jnp.float32)
    adj = jnp.maximum(adj, jnp.swapaxes(adj, -1, -2))  # symmetric 0/1 adjacency

    params = init_params(kp, in_channels, hidden_channels, out_channels)
    ref = _reference(x, adj, params)

    # f32 path (exact semantics, tight tolerance)
    out = jax.block_until_ready(block_forward(x, adj, params))
    assert out.shape == (B, N, out_channels)
    assert jnp.allclose(out, ref, atol=1e-4, rtol=1e-4)

    # bf16 MXU-input fast path (v6e / v7x), f32 accumulation, looser tolerance
    out_bf16 = jax.block_until_ready(
        block_forward(x, adj, params, compute_dtype=jnp.bfloat16))
    assert out_bf16.shape == (B, N, out_channels)
    assert jnp.allclose(out_bf16, ref, atol=5e-2, rtol=5e-2)

    print("KERNEL_OK")
</pallas_src>

<mosaic_0001>
module attributes {stable_mosaic.version = 11 : i64} {
  func.func @_block_kernel(%arg0: i32, %arg1: memref<1x16x4xf32, #tpu.memory_space<vmem>>, %arg2: memref<1x16x16xf32, #tpu.memory_space<vmem>>, %arg3: memref<16x16xf32, #tpu.memory_space<vmem>>, %arg4: memref<4x32xf32, #tpu.memory_space<vmem>>, %arg5: memref<1x32xf32, #tpu.memory_space<vmem>>, %arg6: memref<32x32xf32, #tpu.memory_space<vmem>>, %arg7: memref<1x32xf32, #tpu.memory_space<vmem>>, %arg8: memref<32x128xf32, #tpu.memory_space<vmem>>, %arg9: memref<32x128xf32, #tpu.memory_space<vmem>>, %arg10: memref<1x128xf32, #tpu.memory_space<vmem>>, %arg11: memref<1x16x128xf32, #tpu.memory_space<vmem>>) attributes {dimension_semantics = [#tpu.dimension_semantics<parallel>], iteration_bounds = array<i64: 2>, scalar_prefetch = 0 : i64, scratch_operands = 0 : i64, tpu.core_type = #tpu.core_type<tc>, window_params = [{transform_indices = @transform_0, window_bounds = array<i64: 1, 16, 4>}, {transform_indices = @transform_1, window_bounds = array<i64: 1, 16, 16>}, {pipeline_mode = #tpu.pipeline_mode<synchronous>, transform_indices = @transform_2, window_bounds = array<i64: 16, 16>}, {pipeline_mode = #tpu.pipeline_mode<synchronous>, transform_indices = @transform_3, window_bounds = array<i64: 4, 32>}, {pipeline_mode = #tpu.pipeline_mode<synchronous>, transform_indices = @transform_4, window_bounds = array<i64: 1, 32>}, {pipeline_mode = #tpu.pipeline_mode<synchronous>, transform_indices = @transform_5, window_bounds = array<i64: 32, 32>}, {pipeline_mode = #tpu.pipeline_mode<synchronous>, transform_indices = @transform_6, window_bounds = array<i64: 1, 32>}, {pipeline_mode = #tpu.pipeline_mode<synchronous>, transform_indices = @transform_7, window_bounds = array<i64: 32, 128>}, {pipeline_mode = #tpu.pipeline_mode<synchronous>, transform_indices = @transform_8, window_bounds = array<i64: 32, 128>}, {pipeline_mode = #tpu.pipeline_mode<synchronous>, transform_indices = @transform_9, window_bounds = array<i64: 1, 128>}, {transform_indices = @transform_10, window_bounds = array<i64: 1, 16, 128>}]} {
    %c0 = arith.constant 0 : index
    %c0_0 = arith.constant 0 : index
    %c0_1 = arith.constant 0 : index
    %0 = vector.load %arg1[%c0, %c0_0, %c0_1] : memref<1x16x4xf32, #tpu.memory_space<vmem>>, vector<1x16x4xf32>
    %c0_2 = arith.constant 0 : index
    %c0_3 = arith.constant 0 : index
    %c0_4 = arith.constant 0 : index
    %1 = vector.load %arg2[%c0_2, %c0_3, %c0_4] : memref<1x16x16xf32, #tpu.memory_space<vmem>>, vector<1x16x16xf32>
    %c0_5 = arith.constant 0 : index
    %c0_6 = arith.constant 0 : index
    %2 = vector.load %arg3[%c0_5, %c0_6] : memref<16x16xf32, #tpu.memory_space<vmem>>, vector<16x16xf32>
    %cst = arith.constant 0.000000e+00 : f32
    %3 = vector.broadcast %cst : f32 to vector<16x16xf32>
    %4 = arith.cmpf ogt, %2, %3 : vector<16x16xf32>
    %cst_7 = arith.constant 1.000000e+00 : f32
    %5 = vector.shape_cast %4 : vector<16x16xi1> to vector<1x16x16xi1>
    %6 = vector.broadcast %cst_7 : f32 to vector<1x16x16xf32>
    %7 = arith.select %5, %6, %1 : vector<1x16x16xi1>, vector<1x16x16xf32>
    %cst_8 = arith.constant dense<0.000000e+00> : vector<1x16xf32>
    %8 = vector.multi_reduction <add>, %7, %cst_8 [2] : vector<1x16x16xf32> to vector<1x16xf32>
    %9 = vector.shape_cast %8 : vector<1x16xf32> to vector<1x16x1xf32>
    %cst_9 = arith.constant 1.000000e+00 : f32
    %10 = vector.broadcast %cst_9 : f32 to vector<1x16x1xf32>
    %11 = arith.maximumf %9, %10 : vector<1x16x1xf32>
    %12 = math.rsqrt %11 : vector<1x16x1xf32>
    %13 = vector.broadcast %12 : vector<1x16x1xf32> to vector<1x16x16xf32>
    %14 = arith.mulf %13, %7 : vector<1x16x16xf32>
    %15 = tpu.transpose %12, [0, 2, 1] : vector<1x16x1xf32> -> vector<1x1x16xf32>
    %16 = vector.broadcast %15 : vector<1x1x16xf32> to vector<1x16x16xf32>
    %17 = arith.mulf %14, %16 : vector<1x16x16xf32>
    %c0_10 = arith.constant 0 : index
    %c0_11 = arith.constant 0 : index
    %18 = vector.load %arg4[%c0_10, %c0_11] : memref<4x32xf32, #tpu.memory_space<vmem>>, vector<4x32xf32>
    %c0_12 = arith.constant 0 : index
    %c0_13 = arith.constant 0 : index
    %19 = vector.load %arg6[%c0_12, %c0_13] : memref<32x32xf32, #tpu.memory_space<vmem>>, vector<32x32xf32>
    %c0_14 = arith.constant 0 : index
    %c0_15 = arith.constant 0 : index
    %20 = vector.load %arg8[%c0_14, %c0_15] : memref<32x128xf32, #tpu.memory_space<vmem>>, vector<32x128xf32>
    %c0_16 = arith.constant 0 : index
    %c0_17 = arith.constant 0 : index
    %21 = vector.load %arg9[%c0_16, %c0_17] : memref<32x128xf32, #tpu.memory_space<vmem>>, vector<32x128xf32>
    "tpu.trace_start"() <{level = 10 : i32, message = "bij,bjk->bik"}> : () -> ()
    %cst_18 = arith.constant dense<0.000000e+00> : vector<1x16x4xf32>
    %22 = tpu.matmul %17, %0, %cst_18 {dimension_numbers = #tpu.dot_dimension_numbers<[2], [1], [1], [2], [0, 0, 0, 1, 1, 2], [0], [0]>} : vector<1x16x16xf32>, vector<1x16x4xf32>, vector<1x16x4xf32> -> vector<1x16x4xf32>
    "tpu.trace_stop"() : () -> ()
    %23 = vector.shape_cast %22 : vector<1x16x4xf32> to vector<16x4xf32>
    %cst_19 = arith.constant dense<0.000000e+00> : vector<16x32xf32>
    %24 = tpu.matmul %23, %18, %cst_19 {dimension_numbers = #tpu.dot_dimension_numbers<[1], [0], [0], [1], [0, 0, 1, 1], [], []>} : vector<16x4xf32>, vector<4x32xf32>, vector<16x32xf32> -> vector<16x32xf32>
    %c0_20 = arith.constant 0 : index
    %c0_21 = arith.constant 0 : index
    %25 = vector.load %arg5[%c0_20, %c0_21] : memref<1x32xf32, #tpu.memory_space<vmem>>, vector<1x32xf32>
    %26 = vector.broadcast %25 : vector<1x32xf32> to vector<16x32xf32>
    %27 = arith.addf %24, %26 : vector<16x32xf32>
    %cst_22 = arith.constant 0.000000e+00 : f32
    %28 = vector.broadcast %cst_22 : f32 to vector<16x32xf32>
    %29 = arith.maximumf %27, %28 : vector<16x32xf32>
    %cst_23 = arith.constant dense<0.000000e+00> : vector<16x32xf32>
    %30 = tpu.matmul %29, %19, %cst_23 {dimension_numbers = #tpu.dot_dimension_numbers<[1], [0], [0], [1], [0, 0, 1, 1], [], []>} : vector<16x32xf32>, vector<32x32xf32>, vector<16x32xf32> -> vector<16x32xf32>
    %31 = vector.shape_cast %30 : vector<16x32xf32> to vector<1x16x32xf32>
    "tpu.trace_start"() <{level = 10 : i32, message = "bij,bjk->bik"}> : () -> ()
    %cst_24 = arith.constant dense<0.000000e+00> : vector<1x16x32xf32>
    %32 = tpu.matmul %17, %31, %cst_24 {dimension_numbers = #tpu.dot_dimension_numbers<[2], [1], [1], [2], [0, 0, 0, 1, 1, 2], [0], [0]>} : vector<1x16x16xf32>, vector<1x16x32xf32>, vector<1x16x32xf32> -> vector<1x16x32xf32>
    "tpu.trace_stop"() : () -> ()
    %33 = vector.shape_cast %32 : vector<1x16x32xf32> to vector<16x32xf32>
    %c0_25 = arith.constant 0 : index
    %c0_26 = arith.constant 0 : index
    %34 = vector.load %arg7[%c0_25, %c0_26] : memref<1x32xf32, #tpu.memory_space<vmem>>, vector<1x32xf32>
    %35 = vector.broadcast %34 : vector<1x32xf32> to vector<16x32xf32>
    %36 = arith.addf %33, %35 : vector<16x32xf32>
    %cst_27 = arith.constant 0.000000e+00 : f32
    %37 = vector.broadcast %cst_27 : f32 to vector<16x32xf32>
    %38 = arith.maximumf %36, %37 : vector<16x32xf32>
    %cst_28 = arith.constant dense<0.000000e+00> : vector<16x128xf32>
    %39 = tpu.matmul %29, %20, %cst_28 {dimension_numbers = #tpu.dot_dimension_numbers<[1], [0], [0], [1], [0, 0, 1, 1], [], []>} : vector<16x32xf32>, vector<32x128xf32>, vector<16x128xf32> -> vector<16x128xf32>
    %cst_29 = arith.constant dense<0.000000e+00> : vector<16x128xf32>
    %40 = tpu.matmul %38, %21, %cst_29 {dimension_numbers = #tpu.dot_dimension_numbers<[1], [0], [0], [1], [0, 0, 1, 1], [], []>} : vector<16x32xf32>, vector<32x128xf32>, vector<16x128xf32> -> vector<16x128xf32>
    %41 = arith.addf %39, %40 : vector<16x128xf32>
    %c0_30 = arith.constant 0 : index
    %c0_31 = arith.constant 0 : index
    %42 = vector.load %arg10[%c0_30, %c0_31] : memref<1x128xf32, #tpu.memory_space<vmem>>, vector<1x128xf32>
    %43 = vector.broadcast %42 : vector<1x128xf32> to vector<16x128xf32>
    %44 = arith.addf %41, %43 : vector<16x128xf32>
    %45 = vector.shape_cast %44 : vector<16x128xf32> to vector<1x16x128xf32>
    %c0_32 = arith.constant 0 : index
    %c0_33 = arith.constant 0 : index
    %c0_34 = arith.constant 0 : index
    %46 = vector.load %arg11[%c0_32, %c0_33, %c0_34] : memref<1x16x128xf32, #tpu.memory_space<vmem>>, vector<1x16x128xf32>
    tpu.vector_store %arg11[%c0_32, %c0_33, %c0_34], %45 {strides = array<i32>} : memref<1x16x128xf32, #tpu.memory_space<vmem>>, vector<1x16x128xf32>,
    return
  }
  func.func @transform_0(%arg0: i32) -> (i32, i32, i32) {
    %c0_i32 = arith.constant 0 : i32
    %c0_i32_0 = arith.constant 0 : i32
    %c0_i32_1 = arith.constant 0 : i32
    return %arg0, %c0_i32, %c0_i32_0 : i32, i32, i32
  }
  func.func @transform_1(%arg0: i32) -> (i32, i32, i32) {
    %c0_i32 = arith.constant 0 : i32
    %c0_i32_0 = arith.constant 0 : i32
    %c0_i32_1 = arith.constant 0 : i32
    return %arg0, %c0_i32, %c0_i32_0 : i32, i32, i32
  }
  func.func @transform_2(%arg0: i32) -> (i32, i32) {
    %c0_i32 = arith.constant 0 : i32
    %c0_i32_0 = arith.constant 0 : i32
    %c0_i32_1 = arith.constant 0 : i32
    return %c0_i32, %c0_i32_0 : i32, i32
  }
  func.func @transform_3(%arg0: i32) -> (i32, i32) {
    %c0_i32 = arith.constant 0 : i32
    %c0_i32_0 = arith.constant 0 : i32
    %c0_i32_1 = arith.constant 0 : i32
    return %c0_i32, %c0_i32_0 : i32, i32
  }
  func.func @transform_4(%arg0: i32) -> (i32, i32) {
    %c0_i32 = arith.constant 0 : i32
    %c0_i32_0 = arith.constant 0 : i32
    %c0_i32_1 = arith.constant 0 : i32
    return %c0_i32, %c0_i32_0 : i32, i32
  }
  func.func @transform_5(%arg0: i32) -> (i32, i32) {
    %c0_i32 = arith.constant 0 : i32
    %c0_i32_0 = arith.constant 0 : i32
    %c0_i32_1 = arith.constant 0 : i32
    return %c0_i32, %c0_i32_0 : i32, i32
  }
  func.func @transform_6(%arg0: i32) -> (i32, i32) {
    %c0_i32 = arith.constant 0 : i32
    %c0_i32_0 = arith.constant 0 : i32
    %c0_i32_1 = arith.constant 0 : i32
    return %c0_i32, %c0_i32_0 : i32, i32
  }
  func.func @transform_7(%arg0: i32) -> (i32, i32) {
    %c0_i32 = arith.constant 0 : i32
    %c0_i32_0 = arith.constant 0 : i32
    %c0_i32_1 = arith.constant 0 : i32
    return %c0_i32, %c0_i32_0 : i32, i32
  }
  func.func @transform_8(%arg0: i32) -> (i32, i32) {
    %c0_i32 = arith.constant 0 : i32
    %c0_i32_0 = arith.constant 0 : i32
    %c0_i32_1 = arith.constant 0 : i32
    return %c0_i32, %c0_i32_0 : i32, i32
  }
  func.func @transform_9(%arg0: i32) -> (i32, i32) {
    %c0_i32 = arith.constant 0 : i32
    %c0_i32_0 = arith.constant 0 : i32
    %c0_i32_1 = arith.constant 0 : i32
    return %c0_i32, %c0_i32_0 : i32, i32
  }
  func.func @transform_10(%arg0: i32) -> (i32, i32, i32) {
    %c0_i32 = arith.constant 0 : i32
    %c0_i32_0 = arith.constant 0 : i32
    %c0_i32_1 = arith.constant 0 : i32
    return %arg0, %c0_i32, %c0_i32_0 : i32, i32, i32
  }
}

</mosaic_0001>

<bundles_post_ra>
// kernel: tpu_custom_call.1
= control target key start
LH: loop header
LB: loop body
LE: loop exit
PB: predicated region body
PF: predicated region fallthrough
CT: control target
= control target key end

     0   :  { %15 = vsyncpa [#allocation3], 0  ;;  %s1804_s0 = inlined_call_operand.vmem [shape: f32[2,16,4], index: 0, kind: input, shape index: {}]   ;;  %s1805_s1 = inlined_call_operand.vmem [shape: f32[2,16,16], index: 1, kind: input, shape index: {}]   ;;  %s1806_s2 = inlined_call_operand.hbm [shape: f32[16,16], index: 2, kind: input, shape index: {}]   ;;  %s1807_s3 = inlined_call_operand.vmem [shape: f32[4,32], index: 3, kind: input, shape index: {}]   ;;  %s1808_s4 = inlined_call_operand.vmem [shape: f32[1,32], index: 4, kind: input, shape index: {}]   ;;  %s1809_s5 = inlined_call_operand.hbm [shape: f32[32,32], index: 5, kind: input, shape index: {}]   ;;  %s1810_s6 = inlined_call_operand.vmem [shape: f32[1,32], index: 6, kind: input, shape index: {}]   ;;  %s1811_s7 = inlined_call_operand.hbm [shape: f32[32,128], index: 7, kind: input, shape index: {}]   ;;  %s1812_s8 = inlined_call_operand.hbm [shape: f32[32,128], index: 8, kind: input, shape index: {}]   ;;  %s1813_s9 = inlined_call_operand.vmem [shape: f32[1,128], index: 9, kind: input, shape index: {}]   ;;  %s1814_s10 = inlined_call_operand.hbm [shape: f32[2,16,128], index: 10, kind: output, shape index: {}]  }
   0x1   :  { %16 = vsyncpa [#allocation6], 0 }
   0x2   :  { %17 = vsyncpa [#allocation9], 0 }
   0x3   :  { %18 = vsyncpa [#allocation4], 0 }
   0x4   :  { %20 = vsyncpa [#allocation4 + $0x1], 0  ;;  %s1602_s13 = smov 0   ;;  %s1604_s14 = smov 0  }
   0x5   :  { %s1606_s15 = smov 0   ;;  %s1608_s16 = smov 0  }
   0x6 LB: > { %s1623_s17 = sadd.s32 4294967295, %s1536_s16   ;;  %s1149_s18 = sadd.s32 4294967294, %s1536_s16   ;;  %s1536_s16 = sphi %s1608_s16, %s1824_s16   ;;  %s1532_s15 = sphi %s1606_s15, %s1823_s15   ;;  %s1528_s14 = sphi %s1604_s14, %s1822_s14   ;;  %s1524_s13 = sphi %s1602_s13, %s1821_s13  }
   0x7   : > { %s1627_s19 = sadd.s32 1, %s1536_s16   ;;  %s253_s20 = sadd.s32 1, %s1532_s15 }
   0x8   : > { %s250_s21 = ssub.s32 %s1536_s16, %s1627_s19  ;;  %p263_p0 = scmp.ne.s32.totalorder %s1532_s15, %s1528_s14 }
   0x9   : > { %p251_p1 = scmp.eq.s32.totalorder %s250_s21, 0  ;;  %p264_p2 = scmp.eq.s32.totalorder %s1623_s17, 1 }
   0xa   : > { %p269_p3 = scmp.ne.s32.totalorder %s1528_s14, %s1524_s13  ;;  %p270_p4 = scmp.eq.s32.totalorder %s1149_s18, 1 }
   0xb   : > { %s1638_s22 = scalar_select %p251_p1, %s1532_s15, %s253_s20  }
   0xc   : > { %p1640_p5 = por %p264_p2, %p263_p0  ;;  %p1644_p6 = por %p270_p4, %p269_p3 }
   0xd   : > { %1815 = sst [smem:[#allocation15_spill]] %s1638_s22  ;;  %p1150_p7 = scmp.ge.s32.totalorder %s1536_s16, 1 }
   0xe   : > { %p277_p8 = scmp.lt.s32.totalorder %s1536_s16, 3  ;;  %p1306_p9 = scmp.eq.s32.totalorder %s1623_s17, 0 }
   0xf   : > { %s1538_s26 = smov [#allocation5]   ;;  %s1539_s29 = smov [#allocation2]  }
  0x10   : > { %p1651_p10 = pnand %p1150_p7, %p277_p8  ;;  %s308_s27 = sshll.u32 %s1538_s26, 4  ;;  %s309_s27 = int_to_ptr.vmem [resolvable:$true] %s308_s27 }
  0x11   : > { %s289_s30 = sshll.u32 %s1539_s29, 4  ;;  %s1540_s11 = smov [#allocation7]   ;;  %s290_s30 = int_to_ptr.vmem [resolvable:$true] %s289_s30 }
  0x12   : > { %p1289_p11 = pneg %p1651_p10  ;;  %s324_s12 = sshll.u32 %s1540_s11, 4  ;;  %s325_s12 = int_to_ptr.vmem [resolvable:$true] %s324_s12 }
  0x13   : > { %s1371_s18 = scalar_lea.vmem %s309_s27, 512  ;;  %p1379_p3 = scmp.lt.s32.totalorder %s309_s27, %s309_s27 }
  0x14   : > { %p1659_p12 = pnand %p1306_p9, %p1289_p11  ;;  %p1372_p0 = scmp.ne.s32.totalorder %s309_s27, %s1371_s18 }
  0x15   : > { %p1380_p4 = scmp.lt.s32.totalorder %s1371_s18, %s1371_s18 }
  0x16   : > { %p1362_p13 = pneg %p1659_p12 }
  0x17   : > { %p1381_p7 = por %p1380_p4, %p1379_p3 }
  0x18   : > { %p1374_p1 = pnand %p1372_p0, %p1362_p13 }
  0x1a   : > { %p1375_p2 = pneg %p1374_p1 }
  0x1c   : > { %p1382_p8 = pnand %p1381_p7, %p1375_p2 }
  0x1e   : > { %1385 = shalt.err (!%p1382_p8)
}
  0x1f   : > { %s1541_s20 = smov 128   ;;  %s1542_s21 = smov 8  }
  0x20   : > { %1295 = dma.hbm_to_vmem [thread:$0]  (!%p1659_p12), %s1809_s5, 512, %s309_s27, [#allocation6], %s1541_s20, %s1541_s20, %s1542_s21  }
  0x21   : > { %s1397_s11 = scalar_lea.vmem %s290_s30, 256  ;;  %p1405_p2 = scmp.lt.s32.totalorder %s290_s30, %s290_s30 }
  0x22   : > { %p1398_p11 = scmp.ne.s32.totalorder %s290_s30, %s1397_s11  ;;  %p1406_p3 = scmp.lt.s32.totalorder %s1397_s11, %s1397_s11 }
  0x24   : > { %p1400_p0 = pnand %p1398_p11, %p1362_p13  ;;  %p1407_p4 = por %p1406_p3, %p1405_p2 }
  0x26   : > { %p1401_p1 = pneg %p1400_p0 }
  0x28   : > { %p1408_p7 = pnand %p1407_p4, %p1401_p1 }
  0x2a   : > { %1411 = shalt.err (!%p1408_p7)
}
  0x2b   : > { %1292 = dma.hbm_to_vmem [thread:$0]  (!%p1659_p12), %s1806_s2, 256, %s290_s30, [#allocation3], %s1541_s20, %s1541_s20, %s1542_s21  }
  0x2c   : > { %s1423_s27 = scalar_lea.vmem %s325_s12, 512  ;;  %p1431_p2 = scmp.lt.s32.totalorder %s325_s12, %s325_s12 }
  0x2d   : > { %p1424_p8 = scmp.ne.s32.totalorder %s325_s12, %s1423_s27  ;;  %p1432_p1 = scmp.lt.s32.totalorder %s1423_s27, %s1423_s27 }
  0x2f   : > { %p1426_p11 = pnand %p1424_p8, %p1362_p13  ;;  %p1433_p3 = por %p1432_p1, %p1431_p2 }
  0x31   : > { %p1427_p0 = pneg %p1426_p11 }
  0x33   : > { %p1434_p4 = pnand %p1433_p3, %p1427_p0 }
  0x35   : > { %1437 = shalt.err (!%p1434_p4)
}
  0x36   : > { %1298 = dma.hbm_to_vmem [thread:$0]  (!%p1659_p12), %s1811_s7, 512, %s325_s12, [#allocation6], %s1541_s20, %s1541_s20, %s1542_s21  }
  0x37   : > { %s1543_s30 = smov [#allocation8]  }
  0x38   : > { %s337_s29 = sshll.u32 %s1543_s30, 4  ;;  %s338_s29 = int_to_ptr.vmem [resolvable:$true] %s337_s29 }
  0x39   : > { %s1449_s11 = scalar_lea.vmem %s338_s29, 512  ;;  %p1457_p0 = scmp.lt.s32.totalorder %s338_s29, %s338_s29 }
  0x3a   : > { %p1450_p7 = scmp.ne.s32.totalorder %s338_s29, %s1449_s11  ;;  %p1458_p2 = scmp.lt.s32.totalorder %s1449_s11, %s1449_s11 }
  0x3c   : > { %p1452_p8 = pnand %p1450_p7, %p1362_p13  ;;  %p1459_p1 = por %p1458_p2, %p1457_p0 }
  0x3e   : > { %p1453_p11 = pneg %p1452_p8 }
  0x40   : > { %p1460_p3 = pnand %p1459_p1, %p1453_p11 }
  0x42   : > { %1463 = shalt.err (!%p1460_p3)
}
  0x43   : > { %1301 = dma.hbm_to_vmem [thread:$0]  (!%p1659_p12), %s1812_s8, 512, %s338_s29, [#allocation9], %s1541_s20, %s1541_s20, %s1542_s21  }
  0x44   : > { %372 = sbr.rel (%p1651_p10) target bundleno = 1377 (0x561), region = 60 }
  0x49   : > { %1507 = dma.done.wait (%p1306_p9), [#allocation3], 256  }
  0x4a   : > { %1509 = vsyncadd (%p1306_p9), [#allocation3], 4294967040 }
  0x4b   : > { %1511 = dma.done.wait (%p1306_p9), [#allocation6], 1024  }
  0x4c   : > { %1513 = vsyncadd (%p1306_p9), [#allocation6], 4294966272 }
  0x4d   : > { %1515 = dma.done.wait (%p1306_p9), [#allocation9], 512  }
  0x4e   : > { %1517 = vsyncadd (%p1306_p9), [#allocation9], 4294966784  ;;  %p427_p10 = scmp.lt.s32.totalorder %s1623_s17, 1  ;;  %v441_v1 = vld [vmem:[#allocation2] sm:$0xff]  ;;  %vm447_vm0 = vcmask 130048   ;;  %v442_v3 = vld [vmem:[#allocation2 + $0x8] sm:$0xff]  ;;  %v492_v16 = vlaneseq }
  0x4f   : > { %vm443_vm1 = vcmp.gt.f32.partialorder %v441_v1, 0.0  ;;  %vm444_vm2 = vcmp.gt.f32.partialorder %v442_v3, 0.0  ;;  %v498_v25 = vld [vmem:[%s1807_s3] sm:$0xf]  ;;  %vm606_vm3 = vcmask 1043456   ;;  %v502_v26 = vld [vmem:[#allocation5 + $0x18] sm:$0xff] }
  0x50   : > { %s428_s25 = scalar_select %p427_p10, %s1623_s17, 1  ;;  %v493_v17 = vshrl.u32 %v492_v16, 7  ;;  %1226 = vmatprep.subr.msk.mxu1 %vm606_vm3, %v498_v25  ;;  %vm599_vm4 = vcmask 31744   ;;  %v501_v29 = vld [vmem:[#allocation5 + $0x10] sm:$0xff]  ;;  %v500_v30 = vld [vmem:[#allocation5 + $0x8] sm:$0xff]  ;;  %v499_v31 = vld [vmem:[#allocation5] sm:$0xff] }
  0x51   : > { %1227 = vmatpush3.msk.msra.mxu1 %vm606_vm3, %v498_v25  ;;  %v506_v32 = vld [vmem:[#allocation7 + $0x18] sm:$0xff]  ;;  %v1168_v33 = vld [vmem:[%s1808_s4] ss:$0 sm:$0xff]  ;;  %vm687_vm5 = vcmask 261120   ;;  %v504_v41 = vld [vmem:[#allocation7 + $0x8] sm:$0xff]  ;;  %s424_s20 = sand.u32 1, %s1528_s14  }
  0x52   : > { %s1187_s28 = sshll.u32 %s428_s25, 4  ;;  %v494_v18 = vsub.s32 0, %v493_v17  ;;  %1231 = vmatprep.subr.mxu1 %v502_v26  ;;  %v505_v40 = vld [vmem:[#allocation7 + $0x10] sm:$0xff]  ;;  %v503_v42 = vld [vmem:[#allocation7] sm:$0xff]  ;;  %v510_v45 = vld [vmem:[#allocation8 + $0x18] sm:$0xff]  ;;  %s1161_s21 = sshll.u32 %s424_s20, 4 }
  0x53   : > { %s436_s27 = scalar_lea.vmem %s1805_s1, %s1187_s28  ;;  %s431_s30 = scalar_lea.vmem %s1804_s0, %s1187_s28  ;;  %v509_v46 = vld [vmem:[#allocation8 + $0x10] sm:$0xff]  ;;  %v508_v47 = vld [vmem:[#allocation8 + $0x8] sm:$0xff]  ;;  %v507_v48 = vld [vmem:[#allocation8] sm:$0xff] }
  0x54   : > { %v439_v0 = vld [vmem:[%s436_s27] sm:$0xff]  ;;  %v440_v2 = vld [vmem:[%s436_s27 + $0x8] sm:$0xff]  ;;  %s426_s26 = scalar_lea.vmem [#allocation10], %s1161_s21  ;;  %s1189_s29 = sshll.u32 %s1623_s17, 8 }
  0x55   : > { %v445_v4 = vsel %vm443_vm1, 1.0, %v439_v0  ;;  %v446_v6 = vsel %vm444_vm2, 1.0, %v440_v2  ;;  %v438_v12 = vld [vmem:[%s431_s30 + $0x8] sm:$0xff]  ;;  %v437_v14 = vld [vmem:[%s431_s30] sm:$0xff]  ;;  %s1034_s30 = sshll.u32 %s426_s26, 4  ;;  %s1762_s18 = scalar_lea.hbm %s1814_s10, %s1189_s29  ;;  %s1757_s30 = int_to_ptr.vmem [resolvable:$true] %s1034_s30 }
  0x56   : > { %v448_v5 = vsel %vm447_vm0, %v445_v4, 0.0  ;;  %v451_v7 = vsel %vm447_vm0, %v446_v6, 0.0  ;;  %1219 = vmatprep.subr.mxu0 %v438_v12  ;;  %v1174_v49 = vld [vmem:[%s1810_s6] ss:$0 sm:$0xff]  ;;  %s1764_s25 = scalar_lea.sflag [#allocation4], %s424_s20  ;;  %s1464_s28 = scalar_lea.vmem %s1757_s30, 256 }
  0x57   : > { %449 = vadd.xlane.f32.xlu0 %v448_v5  ;;  %1220 = vmatpush3.msra.mxu0 %v438_v12  ;;  %v1181_v58 = vld [vmem:[%s1813_s9] ss:$0 sm:$0xff]  ;;  %p1465_p9 = scmp.ne.s32.totalorder %s1757_s30, %s1464_s28  ;;  %s1544_s17 = smov [#allocation10]  }
  0x58   : > { %1221 = vmatprep.subr.mxu0 %v437_v14  ;;  %s1468_s21 = sshll.u32 %s1544_s17, 4  ;;  %s1469_s21 = int_to_ptr.vmem [resolvable:$false] %s1468_s21 }
  0x59   : > { %1222 = vmatpush3.msra.mxu0 %v437_v14  ;;  %p1466_p12 = pnand %p1465_p9, %p1640_p5  ;;  %s1470_s27 = scalar_lea.vmem %s1469_s21, 512 }
  0x5a   : > { %p1471_p4 = scmp.lt.s32.totalorder %s1757_s30, %s1469_s21  ;;  %p1472_p7 = scmp.lt.s32.totalorder %s1470_s27, %s1464_s28 }
  0x5b   : > { %452 = vadd.xlane.f32.xlu0 %v451_v7  ;;  %p1467_p13 = pneg %p1466_p12 }
  0x5c   : > { %p1473_p8 = por %p1472_p7, %p1471_p4 }
  0x5e   : > { %p1474_p11 = pnand %p1473_p8, %p1467_p13 }
  0xe0   : > { %v450_v8 = vpop.xlane.xlu0 %449 }
  0xe1   : > { %v454_v9 = vmax.f32 %v450_v8, 1.0 }
  0xe3   : > { %1356 = vrsqrt.f32 %v454_v9 }
  0xe4   : > { %v453_v10 = vpop.xlane.xlu0 %452 }
  0xe5   : > { %v455_v11 = vmax.f32 %v453_v10, 1.0 }
  0xe7   : > { %1358 = vrsqrt.f32 %v455_v11 }
  0xf0   : > { %v1357_v13 = vpop.eup %1356 }
  0xf1   : > { %460 = vxpose.xlu1.b32.start [1/2] (short) (narrow) %v1357_v13, 8  ;;  %v458_v22 = vmul.f32 %v1357_v13, %v445_v4 }
  0xf4   : > { %v1359_v15 = vpop.eup %1358 }
  0xf5   : > { %461 = vxpose.xlu1.b32.end [2/2] (short) (narrow) %v1359_v15, 8  ;;  %v459_v20 = vmul.f32 %v1359_v15, %v446_v6 }
 0x16d   : > { %v476_v19 = vpop.trf.xlu1 }
 0x16e   : > { %v495_v21 = vrot.slane %v476_v19, %v494_v18 }
 0x170   : > { %v497_v23 = vmul.f32 %v495_v21, %v459_v20  ;;  %v496_v24 = vmul.f32 %v495_v21, %v458_v22 }
 0x172   : > { %1223 = vmatprep.mubr.msk.f32.mxu0 %vm447_vm0, %v496_v24 }
 0x173   : > { %1224 = vmatmul.mubr.msk.f32.vlgmr.msra.gmra.mxu0 %vm447_vm0, %v497_v23 }
 0x174   : > { %1246 = vmatprep.mubr.msk.f32.mxu0 %vm447_vm0, %v496_v24 }
 0x233   : > { %v1225_v27 = vpop.f32.mrf.mxu0 }
 0x235   : > { %v583_v28 = vpop.f32.mrf.mxu0 }
 0x236   : > { %1228 = vmatprep.mubr.msk.f32.mxu1 %vm599_vm4, %v583_v28 }
 0x237   : > { %1229 = vmatmul.mubr.msk.f32.vlgmr.msra.gmra.mxu1 %vm599_vm4, %v1225_v27 }
 0x238   : > { %1232 = vmatpush3.msra.mxu1 %v502_v26 }
 0x239   : > { %1233 = vmatprep.subr.mxu1 %v501_v29 }
 0x23a   : > { %1234 = vmatpush3.msra.mxu1 %v501_v29 }
 0x23b   : > { %1235 = vmatprep.subr.mxu1 %v500_v30 }
 0x23c   : > { %1236 = vmatpush3.msra.mxu1 %v500_v30 }
 0x23d   : > { %1237 = vmatprep.subr.mxu1 %v499_v31 }
 0x23e   : > { %1238 = vmatpush3.msra.mxu1 %v499_v31 }
 0x23f   : > { %1260 = vmatprep.subr.mxu1 %v506_v32 }
 0x2f7   : > { %v1230_v34 = vpop.f32.mrf.mxu1 }
 0x2f8   : > { %v682_v35 = vadd.f32 %v1230_v34, %v1168_v33 }
 0x2f9   : > { %v676_v36 = vpop.f32.mrf.mxu1 }
 0x2fa   : > { %v677_v37 = vadd.f32 %v1168_v33, %v676_v36  ;;  %v686_v39 = vmax.f32 %v682_v35, 0.0 }
 0x2fc   : > { %v685_v38 = vmax.f32 %v677_v37, 0.0 }
 0x2fe   : > { %1239 = vmatprep.mubr.msk.f32.mxu1 %vm687_vm5, %v685_v38 }
 0x2ff   : > { %1240 = vmatmul.mubr.msk.f32.vlgmr.msra.gmra.mxu1 %vm687_vm5, %v686_v39 }
 0x300   : > { %1261 = vmatpush3.msra.mxu1 %v506_v32  ;;  %1268 = vmatprep.mubr.msk.f32.mxu1 %vm687_vm5, %v685_v38 }
 0x301   : > { %1262 = vmatprep.subr.mxu1 %v505_v40 }
 0x302   : > { %1263 = vmatpush3.msra.mxu1 %v505_v40 }
 0x303   : > { %1264 = vmatprep.subr.mxu1 %v504_v41 }
 0x304   : > { %1265 = vmatpush3.msra.mxu1 %v504_v41 }
 0x305   : > { %1266 = vmatprep.subr.mxu1 %v503_v42 }
 0x306   : > { %1267 = vmatpush3.msra.mxu1 %v503_v42 }
 0x307   : > { %1269 = vmatmul.mubr.msk.f32.vlgmr.msra.gmra.mxu1 %vm687_vm5, %v686_v39 }
 0x3bf   : > { %v1241_v43 = vpop.f32.mrf.mxu1 }
 0x3c0   : > { %1242 = vmatprep.subr.mxu0 %v1241_v43 }
 0x3c1   : > { %v760_v44 = vpop.f32.mrf.mxu1  ;;  %1243 = vmatpush3.msra.mxu0 %v1241_v43 }
 0x3c2   : > { %1244 = vmatprep.subr.mxu0 %v760_v44 }
 0x3c3   : > { %1245 = vmatpush3.msra.mxu0 %v760_v44 }
 0x3c4   : > { %1247 = vmatmul.mubr.msk.f32.vlgmr.msra.gmra.mxu0 %vm447_vm0, %v497_v23  ;;  %1249 = vmatprep.subr.mxu0 %v510_v45 }
 0x3c5   : > { %1250 = vmatpush3.msra.mxu0 %v510_v45 }
 0x3c6   : > { %1251 = vmatprep.subr.mxu0 %v509_v46 }
 0x3c7   : > { %1252 = vmatpush3.msra.mxu0 %v509_v46  ;;  %v1270_v56 = vpop.f32.mrf.mxu1 }
 0x3c8   : > { %1253 = vmatprep.subr.mxu0 %v508_v47 }
 0x3c9   : > { %1254 = vmatpush3.msra.mxu0 %v508_v47  ;;  %v1000_v60 = vpop.f32.mrf.mxu1 }
 0x3ca   : > { %1255 = vmatprep.subr.mxu0 %v507_v48 }
 0x3cb   : > { %1256 = vmatpush3.msra.mxu0 %v507_v48 }
 0x484   : > { %v1248_v50 = vpop.f32.mrf.mxu0 }
 0x485   : > { %v848_v51 = vadd.f32 %v1248_v50, %v1174_v49 }
 0x486   : > { %v842_v52 = vpop.f32.mrf.mxu0 }
 0x487   : > { %v843_v53 = vadd.f32 %v1174_v49, %v842_v52  ;;  %v852_v55 = vmax.f32 %v848_v51, 0.0 }
 0x489   : > { %v851_v54 = vmax.f32 %v843_v53, 0.0 }
 0x48b   : > { %1257 = vmatprep.mubr.msk.f32.mxu0 %vm687_vm5, %v851_v54 }
 0x48c   : > { %1258 = vmatmul.mubr.msk.f32.vlgmr.msra.gmra.mxu0 %vm687_vm5, %v852_v55 }
 0x54c   : > { %v1259_v57 = vpop.f32.mrf.mxu0 }
 0x54d   : > { %v1006_v59 = vadd.f32 %v1270_v56, %v1259_v57 }
 0x54e   : > { %v925_v61 = vpop.f32.mrf.mxu0 }
 0x54f   : > { %v1017_v62 = vadd.f32 %v1181_v58, %v1006_v59  ;;  %v1001_v63 = vadd.f32 %v1000_v60, %v925_v61 }
 0x551   : > { %1019 = vst [vmem:[%s426_s26 + $0x8] sm:$0xff] %v1017_v62  ;;  %v1016_v0 = vadd.f32 %v1181_v58, %v1001_v63 }
 0x553   : > { %1018 = vst [vmem:[%s426_s26] sm:$0xff] %v1016_v0 }
 0x554   : > { %1477 = shalt.err (!%p1474_p11)
}
 0x555   : > { %s1478_s20 = scalar_lea.hbm %s1762_s18, 256  ;;  %s1482_s29 = scalar_lea.hbm %s1814_s10, 512 }
 0x556   : > { %p1479_p0 = scmp.ne.s32.totalorder %s1762_s18, %s1478_s20  ;;  %p1483_p3 = scmp.lt.s32.totalorder %s1762_s18, %s1814_s10 }
 0x557   : > { %p1484_p10 = scmp.lt.s32.totalorder %s1482_s29, %s1478_s20 }
 0x558   : > { %p1480_p2 = pnand %p1479_p0, %p1640_p5 }
 0x559   : > { %p1485_p9 = por %p1484_p10, %p1483_p3 }
 0x55a   : > { %p1481_p1 = pneg %p1480_p2 }
 0x55c   : > { %p1486_p12 = pnand %p1485_p9, %p1481_p1 }
 0x55e   : > { %1489 = shalt.err (!%p1486_p12)
}
 0x55f   : > { %s1545_s28 = smov 128   ;;  %s1546_s17 = smov 8  }
 0x560   : > { %1287 = dma.vmem_to_hbm [thread:$0]  (%p1640_p5), %s1757_s30, 256, %s1762_s18, %s1764_s25, %s1545_s28, %s1545_s28, %s1546_s17  }
 0x561 PF: > { %p1314_p13 = scmp.ge.s32.totalorder %s1536_s16, 2  ;;  %s1049_s21 = sand.u32 1, %s1524_s13  }
 0x562   : > { %s1050_s27 = scalar_lea.sflag [#allocation4], %s1049_s21 }
 0x563   : > { %p1303_p4 = pnand %p1314_p13, %p1644_p6 }
 0x565   : > { %p1304_p7 = pneg %p1303_p4 }
 0x567   : > { %1519 = dma.done.wait (%p1304_p7), %s1050_s27, 256  }
 0x568   : > { %1521 = vsyncadd (%p1304_p7), %s1050_s27, 4294967040  ;;  %s1820_s20 = sld [smem:[#allocation15_spill]]  ;;  %p23_p8 = scmp.ge.s32.totalorder %s1627_s19, 4  }
 0x569   : > { %s1821_s13 = smov %s1528_s14  ;;  %s1822_s14 = smov %s1532_s15 }
 0x56a   : > { %s1824_s16 = smov %s1627_s19  ;;  %25 = sbr.rel (!%p23_p8) target bundleno = 6 (0x6), region = 115 }
 0x56e   : > { %s1823_s15 = smov %s1820_s20 }
 0x56f   :  { %1055 = vsyncpa [#allocation3], 1 }
 0x570   :  { %1057 = vsyncpa [#allocation3 + $0x1], 1 }
 0x571   :  { %1058 = vsyncpa [#allocation6], 1 }
 0x572   :  { %1059 = vsyncpa [#allocation9], 1 }
 0x573   :  { %1060 = vsyncpa [#allocation4], 1 }
 0x574   :  { %1062 = vsyncpa [#allocation4 + $0x1], 1 }

</bundles_post_ra>
